<compile_context>
chip_gen: v5e
topology: v5e:2x2
jax: 0.10.0
libtpu: 0.0.40
codegen_flags: <defaults>
</compile_context>

<pallas_src>
import functools

import jax
import jax.numpy as jnp
from jax.experimental import pallas as pl
from jax.experimental.pallas import tpu as pltpu


def _roll_kernel(x_ref, o_ref, *, p_left, p_right, p_top, p_bottom, H, W):
    """Wrap-pad via XLU rolls + one start-aligned bulk store and <= 3 tail stores.

    Valid when p_top + p_bottom <= H and p_left + p_right <= W.
    z[h, w] = x[(h - p_top) % H, (w - p_left) % W], i.e. z is exactly the top-left
    HxW window of the padded output; the tails reuse its leading rows/columns.
    """
    z = x_ref[...]
    if p_top > 0:
        z = pltpu.roll(z, p_top, axis=1)     # sublane rotate (XLU)
    if p_left > 0:
        z = pltpu.roll(z, p_left, axis=2)    # lane rotate (XLU)

    ph = p_top + p_bottom
    pw = p_left + p_right

    o_ref[:, :H, :W] = z                     # start-aligned dominant store
    if ph > 0:
        o_ref[:, H:, :W] = z[:, :ph, :]
    if pw > 0:
        o_ref[:, :H, W:] = z[:, :, :pw]
    if ph > 0 and pw > 0:
        o_ref[:, H:, W:] = z[:, :ph, :pw]


def _strip_kernel(x_ref, o_ref, *, p_left, p_right, p_top, p_bottom, H, W):
    """Fallback: interior + up to 8 wrap strips via direct slice stores.

    All slice offsets are static Python ints; column strips are sliced from the
    ref so Mosaic emits narrow loads rather than cross-lane extracts.
    """
    # (dst_row_offset, src_row_start, n_rows)
    bands = [(p_top, 0, H)]                                  # interior rows
    if p_top > 0:
        bands.append((0, H - p_top, p_top))                  # wrapped top rows
    if p_bottom > 0:
        bands.append((p_top + H, 0, p_bottom))               # wrapped bottom rows

    for dst_r, src_r, n in bands:
        # centre columns
        o_ref[:, dst_r:dst_r + n, p_left:p_left + W] = x_ref[:, src_r:src_r + n, :]
        # wrapped left columns (last p_left cols of the source band)
        if p_left > 0:
            o_ref[:, dst_r:dst_r + n, :p_left] = x_ref[:, src_r:src_r + n, W - p_left:]
        # wrapped right columns (first p_right cols of the source band)
        if p_right > 0:
            o_ref[:, dst_r:dst_r + n, p_left + W:] = x_ref[:, src_r:src_r + n, :p_right]


def _parse_padding(padding_size):
    """Returns (p_left, p_right, p_top, p_bottom), mirroring SphericPad.__init__."""
    if isinstance(padding_size, int):
        p = int(padding_size)
        return p, p, p, p
    if isinstance(padding_size, (tuple, list)):
        if len(padding_size) == 2:
            pw, ph = int(padding_size[0]), int(padding_size[1])
            return pw, pw, ph, ph
        if len(padding_size) == 4:
            left, top, right, bottom = (int(v) for v in padding_size)
            return left, right, top, bottom
    raise ValueError(
        "The padding size should be: int or tuple of size 2 or tuple of size 4")


def _pick_bc_tile(total, cap):
    """Largest divisor of `total` that is <= cap (cap clamped to [1, total])."""
    cap = max(1, min(total, cap))
    for t in range(cap, 0, -1):
        if total % t == 0:
            return t
    return 1


def spheric_pad(x, padding_size):
    """Equivalent of SphericPad.forward for an NCHW input `x`."""
    p_left, p_right, p_top, p_bottom = _parse_padding(padding_size)
    B, C, H, W = x.shape

    # Single-wrap semantics (same as the torch cat-sequence); fail loudly otherwise.
    if not (0 <= p_top <= H and 0 <= p_bottom <= H and 0 <= p_left <= W and 0 <= p_right <= W):
        raise ValueError("SphericPad (Pallas) requires 0 <= pad <= corresponding spatial dim")

    H_out = H + p_top + p_bottom
    W_out = W + p_left + p_right

    BC = B * C
    x2 = x.reshape(BC, H, W)   # free reshape: merges contiguous leading dims

    # --- VMEM-aware block sizing -------------------------------------------------
    itemsize = jnp.dtype(x.dtype).itemsize
    # Double-buffered input + output footprint of ONE (H, W) plane (2x baked in here).
    per_plane = 2 * (H * W + H_out * W_out) * itemsize
    try:
        vmem_cap = int(pltpu.get_tpu_info().vmem_capacity_bytes)
    except Exception:
        vmem_cap = 64 * 1024 * 1024      # conservative: v7x physical VMEM
    budget = min(48 * 1024 * 1024, vmem_cap // 2)

    cap = max(1, budget // max(per_plane, 1))
    if BC >= 2:
        cap = min(cap, BC // 2)          # keep >= 2 grid steps so v7x megacore has work
    bc_tile = _pick_bc_tile(BC, cap)
    grid = (BC // bc_tile,)

    block_bytes = bc_tile * per_plane                 # already includes double-buffering
    compiler_kwargs = {"dimension_semantics": ("parallel",)}
    vmem_needed = block_bytes + 4 * 1024 * 1024       # + Mosaic internal-scratch headroom
    if vmem_needed > 16 * 1024 * 1024:                # above the smallest scoped default (v5e)
        compiler_kwargs["vmem_limit_bytes"] = int(
            min(vmem_needed, max(vmem_cap - 8 * 1024 * 1024, 16 * 1024 * 1024)))
    # TODO(synk): if a single plane still exceeds VMEM, tile H into row chunks (only the
    # first/last chunk needs wrap rows) or use a pure-DMA HBM->HBM strided-copy path.

    def _call(kernel_fn):
        kernel = functools.partial(
            kernel_fn,
            p_left=p_left, p_right=p_right, p_top=p_top, p_bottom=p_bottom, H=H, W=W)
        return pl.pallas_call(
            kernel,
            out_shape=jax.ShapeDtypeStruct((BC, H_out, W_out), x.dtype),
            grid=grid,
            # Last two block dims equal the full array dims -> (8,128) escape hatch.
            in_specs=[pl.BlockSpec((bc_tile, H, W), lambda i: (i, 0, 0))],
            out_specs=pl.BlockSpec((bc_tile, H_out, W_out), lambda i: (i, 0, 0)),
            compiler_params=pltpu.CompilerParams(**compiler_kwargs),
        )(x2)

    # Roll-based tail trick requires total pads to fit within the original dims.
    use_roll = (p_top + p_bottom) <= H and (p_left + p_right) <= W
    if use_roll:
        try:
            out2 = _call(_roll_kernel)
        except Exception:
            # pltpu.roll lowering can be shape-dependent; strip path is always valid.
            out2 = _call(_strip_kernel)
    else:
        out2 = _call(_strip_kernel)

    return out2.reshape(B, C, H_out, W_out)


if __name__ == "__main__":
    key = jax.random.PRNGKey(0)
    B, C, H, W = 2, 4, 16, 16
    x = jax.random.normal(key, (B, C, H, W), dtype=jnp.float32)

    # 4-tuple padding: (left, top, right, bottom)  -> exercises the roll path.
    padding_size = (2, 3, 1, 2)
    out = jax.block_until_ready(spheric_pad(x, padding_size))
    p_l, p_t, p_r, p_b = padding_size
    ref = jnp.pad(x, ((0, 0), (0, 0), (p_t, p_b), (p_l, p_r)), mode="wrap")
    assert out.shape == ref.shape, (out.shape, ref.shape)
    assert out.dtype == x.dtype
    assert jnp.allclose(out, ref), "mismatch vs wrap-padding reference (4-tuple)"

    # Symmetric int padding -> roll path, different offsets.
    out2 = jax.block_until_ready(spheric_pad(x, 4))
    ref2 = jnp.pad(x, ((0, 0), (0, 0), (4, 4), (4, 4)), mode="wrap")
    assert jnp.allclose(out2, ref2), "mismatch vs wrap-padding reference (int pad)"

    # Full wrap (pads == dims) -> exercises the strip fallback path.
    out3 = jax.block_until_ready(spheric_pad(x, (W, H, W, H)))
    ref3 = jnp.pad(x, ((0, 0), (0, 0), (H, H), (W, W)), mode="wrap")
    assert jnp.allclose(out3, ref3), "mismatch vs wrap-padding reference (full wrap)"

    print("KERNEL_OK")
</pallas_src>

<mosaic_0001>
module attributes {stable_mosaic.version = 11 : i64} {
  func.func @_roll_kernel(%arg0: i32, %arg1: memref<4x16x16xf32, #tpu.memory_space<vmem>>, %arg2: memref<4x21x19xf32, #tpu.memory_space<vmem>>) attributes {dimension_semantics = [#tpu.dimension_semantics<parallel>], iteration_bounds = array<i64: 2>, scalar_prefetch = 0 : i64, scratch_operands = 0 : i64, tpu.core_type = #tpu.core_type<tc>, window_params = [{transform_indices = @transform_0, window_bounds = array<i64: 4, 16, 16>}, {transform_indices = @transform_1, window_bounds = array<i64: 4, 21, 19>}]} {
    %c0 = arith.constant 0 : index
    %c0_0 = arith.constant 0 : index
    %c0_1 = arith.constant 0 : index
    %0 = vector.load %arg1[%c0, %c0_0, %c0_1] : memref<4x16x16xf32, #tpu.memory_space<vmem>>, vector<4x16x16xf32>
    %c3_i32 = arith.constant 3 : i32
    %1 = tpu.dynamic_rotate %0 by %c3_i32 dim 1 : vector<4x16x16xf32>, i32 -> vector<4x16x16xf32>
    %c2_i32 = arith.constant 2 : i32
    %2 = tpu.dynamic_rotate %1 by %c2_i32 dim 2 : vector<4x16x16xf32>, i32 -> vector<4x16x16xf32>
    %c0_2 = arith.constant 0 : index
    %c0_3 = arith.constant 0 : index
    %c0_4 = arith.constant 0 : index
    %3 = vector.load %arg2[%c0_2, %c0_3, %c0_4] : memref<4x21x19xf32, #tpu.memory_space<vmem>>, vector<4x16x16xf32>
    tpu.vector_store %arg2[%c0_2, %c0_3, %c0_4], %2 {strides = array<i32>} : memref<4x21x19xf32, #tpu.memory_space<vmem>>, vector<4x16x16xf32>,
    %4 = vector.extract_strided_slice %2 {offsets = [0, 0, 0], sizes = [4, 5, 16], strides = [1, 1, 1]} : vector<4x16x16xf32> to vector<4x5x16xf32>
    %c0_5 = arith.constant 0 : index
    %c16 = arith.constant 16 : index
    %c0_6 = arith.constant 0 : index
    %5 = vector.load %arg2[%c0_5, %c16, %c0_6] : memref<4x21x19xf32, #tpu.memory_space<vmem>>, vector<4x5x16xf32>
    tpu.vector_store %arg2[%c0_5, %c16, %c0_6], %4 {strides = array<i32>} : memref<4x21x19xf32, #tpu.memory_space<vmem>>, vector<4x5x16xf32>,
    %6 = vector.extract_strided_slice %2 {offsets = [0, 0, 0], sizes = [4, 16, 3], strides = [1, 1, 1]} : vector<4x16x16xf32> to vector<4x16x3xf32>
    %c0_7 = arith.constant 0 : index
    %c0_8 = arith.constant 0 : index
    %c16_9 = arith.constant 16 : index
    %7 = vector.load %arg2[%c0_7, %c0_8, %c16_9] : memref<4x21x19xf32, #tpu.memory_space<vmem>>, vector<4x16x3xf32>
    tpu.vector_store %arg2[%c0_7, %c0_8, %c16_9], %6 {strides = array<i32>} : memref<4x21x19xf32, #tpu.memory_space<vmem>>, vector<4x16x3xf32>,
    %8 = vector.extract_strided_slice %2 {offsets = [0, 0, 0], sizes = [4, 5, 3], strides = [1, 1, 1]} : vector<4x16x16xf32> to vector<4x5x3xf32>
    %c0_10 = arith.constant 0 : index
    %c16_11 = arith.constant 16 : index
    %c16_12 = arith.constant 16 : index
    %9 = vector.load %arg2[%c0_10, %c16_11, %c16_12] : memref<4x21x19xf32, #tpu.memory_space<vmem>>, vector<4x5x3xf32>
    tpu.vector_store %arg2[%c0_10, %c16_11, %c16_12], %8 {strides = array<i32>} : memref<4x21x19xf32, #tpu.memory_space<vmem>>, vector<4x5x3xf32>,
    return
  }
  func.func @transform_0(%arg0: i32) -> (i32, i32, i32) {
    %c0_i32 = arith.constant 0 : i32
    %c0_i32_0 = arith.constant 0 : i32
    %c0_i32_1 = arith.constant 0 : i32
    return %arg0, %c0_i32, %c0_i32_0 : i32, i32, i32
  }
  func.func @transform_1(%arg0: i32) -> (i32, i32, i32) {
    %c0_i32 = arith.constant 0 : i32
    %c0_i32_0 = arith.constant 0 : i32
    %c0_i32_1 = arith.constant 0 : i32
    return %arg0, %c0_i32, %c0_i32_0 : i32, i32, i32
  }
}

module attributes {stable_mosaic.version = 11 : i64} {
  func.func @_strip_kernel(%arg0: i32, %arg1: memref<4x16x16xf32, #tpu.memory_space<vmem>>, %arg2: memref<4x21x19xf32, #tpu.memory_space<vmem>>) attributes {dimension_semantics = [#tpu.dimension_semantics<parallel>], iteration_bounds = array<i64: 2>, scalar_prefetch = 0 : i64, scratch_operands = 0 : i64, tpu.core_type = #tpu.core_type<tc>, window_params = [{transform_indices = @transform_0, window_bounds = array<i64: 4, 16, 16>}, {transform_indices = @transform_1, window_bounds = array<i64: 4, 21, 19>}]} {
    %c0 = arith.constant 0 : index
    %c0_0 = arith.constant 0 : index
    %c0_1 = arith.constant 0 : index
    %0 = vector.load %arg1[%c0, %c0_0, %c0_1] : memref<4x16x16xf32, #tpu.memory_space<vmem>>, vector<4x16x16xf32>
    %c0_2 = arith.constant 0 : index
    %c3 = arith.constant 3 : index
    %c2 = arith.constant 2 : index
    %1 = vector.load %arg2[%c0_2, %c3, %c2] : memref<4x21x19xf32, #tpu.memory_space<vmem>>, vector<4x16x16xf32>
    tpu.vector_store %arg2[%c0_2, %c3, %c2], %0 {strides = array<i32>} : memref<4x21x19xf32, #tpu.memory_space<vmem>>, vector<4x16x16xf32>,
    %c0_3 = arith.constant 0 : index
    %c0_4 = arith.constant 0 : index
    %c14 = arith.constant 14 : index
    %2 = vector.load %arg1[%c0_3, %c0_4, %c14] : memref<4x16x16xf32, #tpu.memory_space<vmem>>, vector<4x16x2xf32>
    %c0_5 = arith.constant 0 : index
    %c3_6 = arith.constant 3 : index
    %c0_7 = arith.constant 0 : index
    %3 = vector.load %arg2[%c0_5, %c3_6, %c0_7] : memref<4x21x19xf32, #tpu.memory_space<vmem>>, vector<4x16x2xf32>
    tpu.vector_store %arg2[%c0_5, %c3_6, %c0_7], %2 {strides = array<i32>} : memref<4x21x19xf32, #tpu.memory_space<vmem>>, vector<4x16x2xf32>,
    %c0_8 = arith.constant 0 : index
    %c0_9 = arith.constant 0 : index
    %c0_10 = arith.constant 0 : index
    %4 = vector.load %arg1[%c0_8, %c0_9, %c0_10] : memref<4x16x16xf32, #tpu.memory_space<vmem>>, vector<4x16x1xf32>
    %c0_11 = arith.constant 0 : index
    %c3_12 = arith.constant 3 : index
    %c18 = arith.constant 18 : index
    %5 = vector.load %arg2[%c0_11, %c3_12, %c18] : memref<4x21x19xf32, #tpu.memory_space<vmem>>, vector<4x16x1xf32>
    tpu.vector_store %arg2[%c0_11, %c3_12, %c18], %4 {strides = array<i32>} : memref<4x21x19xf32, #tpu.memory_space<vmem>>, vector<4x16x1xf32>,
    %c0_13 = arith.constant 0 : index
    %c13 = arith.constant 13 : index
    %c0_14 = arith.constant 0 : index
    %6 = vector.load %arg1[%c0_13, %c13, %c0_14] : memref<4x16x16xf32, #tpu.memory_space<vmem>>, vector<4x3x16xf32>
    %c0_15 = arith.constant 0 : index
    %c0_16 = arith.constant 0 : index
    %c2_17 = arith.constant 2 : index
    %7 = vector.load %arg2[%c0_15, %c0_16, %c2_17] : memref<4x21x19xf32, #tpu.memory_space<vmem>>, vector<4x3x16xf32>
    tpu.vector_store %arg2[%c0_15, %c0_16, %c2_17], %6 {strides = array<i32>} : memref<4x21x19xf32, #tpu.memory_space<vmem>>, vector<4x3x16xf32>,
    %c0_18 = arith.constant 0 : index
    %c13_19 = arith.constant 13 : index
    %c14_20 = arith.constant 14 : index
    %8 = vector.load %arg1[%c0_18, %c13_19, %c14_20] : memref<4x16x16xf32, #tpu.memory_space<vmem>>, vector<4x3x2xf32>
    %c0_21 = arith.constant 0 : index
    %c0_22 = arith.constant 0 : index
    %c0_23 = arith.constant 0 : index
    %9 = vector.load %arg2[%c0_21, %c0_22, %c0_23] : memref<4x21x19xf32, #tpu.memory_space<vmem>>, vector<4x3x2xf32>
    tpu.vector_store %arg2[%c0_21, %c0_22, %c0_23], %8 {strides = array<i32>} : memref<4x21x19xf32, #tpu.memory_space<vmem>>, vector<4x3x2xf32>,
    %c0_24 = arith.constant 0 : index
    %c13_25 = arith.constant 13 : index
    %c0_26 = arith.constant 0 : index
    %10 = vector.load %arg1[%c0_24, %c13_25, %c0_26] : memref<4x16x16xf32, #tpu.memory_space<vmem>>, vector<4x3x1xf32>
    %c0_27 = arith.constant 0 : index
    %c0_28 = arith.constant 0 : index
    %c18_29 = arith.constant 18 : index
    %11 = vector.load %arg2[%c0_27, %c0_28, %c18_29] : memref<4x21x19xf32, #tpu.memory_space<vmem>>, vector<4x3x1xf32>
    tpu.vector_store %arg2[%c0_27, %c0_28, %c18_29], %10 {strides = array<i32>} : memref<4x21x19xf32, #tpu.memory_space<vmem>>, vector<4x3x1xf32>,
    %c0_30 = arith.constant 0 : index
    %c0_31 = arith.constant 0 : index
    %c0_32 = arith.constant 0 : index
    %12 = vector.load %arg1[%c0_30, %c0_31, %c0_32] : memref<4x16x16xf32, #tpu.memory_space<vmem>>, vector<4x2x16xf32>
    %c0_33 = arith.constant 0 : index
    %c19 = arith.constant 19 : index
    %c2_34 = arith.constant 2 : index
    %13 = vector.load %arg2[%c0_33, %c19, %c2_34] : memref<4x21x19xf32, #tpu.memory_space<vmem>>, vector<4x2x16xf32>
    tpu.vector_store %arg2[%c0_33, %c19, %c2_34], %12 {strides = array<i32>} : memref<4x21x19xf32, #tpu.memory_space<vmem>>, vector<4x2x16xf32>,
    %c0_35 = arith.constant 0 : index
    %c0_36 = arith.constant 0 : index
    %c14_37 = arith.constant 14 : index
    %14 = vector.load %arg1[%c0_35, %c0_36, %c14_37] : memref<4x16x16xf32, #tpu.memory_space<vmem>>, vector<4x2x2xf32>
    %c0_38 = arith.constant 0 : index
    %c19_39 = arith.constant 19 : index
    %c0_40 = arith.constant 0 : index
    %15 = vector.load %arg2[%c0_38, %c19_39, %c0_40] : memref<4x21x19xf32, #tpu.memory_space<vmem>>, vector<4x2x2xf32>
    tpu.vector_store %arg2[%c0_38, %c19_39, %c0_40], %14 {strides = array<i32>} : memref<4x21x19xf32, #tpu.memory_space<vmem>>, vector<4x2x2xf32>,
    %c0_41 = arith.constant 0 : index
    %c0_42 = arith.constant 0 : index
    %c0_43 = arith.constant 0 : index
    %16 = vector.load %arg1[%c0_41, %c0_42, %c0_43] : memref<4x16x16xf32, #tpu.memory_space<vmem>>, vector<4x2x1xf32>
    %c0_44 = arith.constant 0 : index
    %c19_45 = arith.constant 19 : index
    %c18_46 = arith.constant 18 : index
    %17 = vector.load %arg2[%c0_44, %c19_45, %c18_46] : memref<4x21x19xf32, #tpu.memory_space<vmem>>, vector<4x2x1xf32>
    tpu.vector_store %arg2[%c0_44, %c19_45, %c18_46], %16 {strides = array<i32>} : memref<4x21x19xf32, #tpu.memory_space<vmem>>, vector<4x2x1xf32>,
    return
  }
  func.func @transform_0(%arg0: i32) -> (i32, i32, i32) {
    %c0_i32 = arith.constant 0 : i32
    %c0_i32_0 = arith.constant 0 : i32
    %c0_i32_1 = arith.constant 0 : i32
    return %arg0, %c0_i32, %c0_i32_0 : i32, i32, i32
  }
  func.func @transform_1(%arg0: i32) -> (i32, i32, i32) {
    %c0_i32 = arith.constant 0 : i32
    %c0_i32_0 = arith.constant 0 : i32
    %c0_i32_1 = arith.constant 0 : i32
    return %arg0, %c0_i32, %c0_i32_0 : i32, i32, i32
  }
}

</mosaic_0001>

<bundles_post_ra>
// kernel: tpu_custom_call.1
= control target key start
LH: loop header
LB: loop body
LE: loop exit
PB: predicated region body
PF: predicated region fallthrough
CT: control target
= control target key end

     0   :  { %6 = vsyncpa [#allocation3], 0  ;;  %s701_s0 = inlined_call_operand.hbm [shape: f32[8,16,16], index: 0, kind: input, shape index: {}]   ;;  %s702_s1 = inlined_call_operand.vmem [shape: f32[8,21,19], index: 1, kind: output, shape index: {}]  }
   0x1   :  { %8 = vsyncpa [#allocation3 + $0x1], 0  ;;  %s515_s6 = smov 0   ;;  %s517_s7 = smov 0  }
   0x2   :  { %s519_s8 = smov 0   ;;  %s521_s9 = smov 0  }
   0x3 LB: > { %s373_s10 = sadd.s32 4294967295, %s498_s9   ;;  %s535_s11 = sadd.s32 1, %s498_s9   ;;  %s498_s9 = sphi %s521_s9, %s709_s9   ;;  %s494_s8 = sphi %s519_s8, %s708_s8   ;;  %s490_s7 = sphi %s517_s7, %s707_s7   ;;  %s486_s6 = sphi %s515_s6, %s706_s6  }
   0x4   : > { %s18_s12 = ssub.s32 %s498_s9, %s535_s11  ;;  %s21_s13 = sadd.s32 1, %s494_s8 }
   0x5   : > { %p19_p0 = scmp.eq.s32.totalorder %s18_s12, 0  ;;  %p28_p1 = scmp.ne.s32.totalorder %s494_s8, %s490_s7 }
   0x6   : > { %p29_p2 = scmp.eq.s32.totalorder %s498_s9, 0  ;;  %p34_p3 = scmp.ne.s32.totalorder %s490_s7, %s486_s6 }
   0x7   : > { %s545_s14 = scalar_select %p19_p0, %s494_s8, %s21_s13  }
   0x8   : > { %p547_p4 = por %p29_p2, %p28_p1  ;;  %p35_p5 = scmp.eq.s32.totalorder %s373_s10, 0 }
   0x9   : > { %p396_p6 = scmp.lt.s32.totalorder %s498_s9, 2  ;;  %s84_s17 = sand.u32 1, %s494_s8  }
   0xa   : > { %p554_p7 = por %p35_p5, %p34_p3  ;;  %s377_s18 = sshll.u32 %s84_s17, 6 }
   0xb   : > { %s388_s19 = sshll.u32 %s498_s9, 6  ;;  %s88_s23 = scalar_lea.vmem [#allocation2], %s377_s18 }
   0xc   : > { %s94_s22 = scalar_lea.hbm %s701_s0, %s388_s19  ;;  %s97_s24 = sshll.u32 %s88_s23, 4  ;;  %s98_s24 = int_to_ptr.vmem [resolvable:$true] %s97_s24 }
   0xd   : > { %s95_s25 = sshll.u32 %s94_s22, 4  ;;  %p565_p8 = pnand %p396_p6, %p547_p4  ;;  %s96_s25 = int_to_ptr.hbm [resolvable:$true] %s95_s25 }
   0xe   : > { %p381_p9 = scmp.ge.s32.totalorder %s498_s9, 1  ;;  %s85_s27 = scalar_lea.sflag [#allocation3], %s84_s17 }
   0xf   : > { %s434_s28 = sshra.s32 %s96_s25, 4  ;;  %p438_p11 = pneg %p565_p8  ;;  %s435_s28 = int_to_ptr.hbm [resolvable:$true] %s434_s28 }
  0x10   : > { %s436_s29 = scalar_lea.hbm %s435_s28, 64  ;;  %s441_s3 = scalar_lea.hbm %s701_s0, 128 }
  0x11   : > { %p437_p10 = scmp.ne.s32.totalorder %s435_s28, %s436_s29  ;;  %p442_p0 = scmp.lt.s32.totalorder %s435_s28, %s701_s0 }
  0x12   : > { %p443_p1 = scmp.lt.s32.totalorder %s441_s3, %s436_s29 }
  0x13   : > { %p439_p12 = pnand %p438_p11, %p437_p10 }
  0x14   : > { %p444_p2 = por %p443_p1, %p442_p0 }
  0x15   : > { %p440_p13 = pneg %p439_p12 }
  0x17   : > { %p445_p3 = pnand %p444_p2, %p440_p13 }
  0x19   : > { %448 = shalt.err (!%p445_p3)
}
  0x1a   : > { %s500_s6 = smov 128   ;;  %s501_s12 = smov 8  }
  0x1b   : > { %395 = dma.hbm_to_vmem [thread:$0]  (!%p565_p8), %s96_s25, 1024, %s98_s24, %s85_s27, %s500_s6, %s500_s6, %s501_s12  }
  0x1c   : > { %p105_p4 = scmp.lt.s32.totalorder %s498_s9, 3 }
  0x1e   : > { %p106_p5 = pnand %p381_p9, %p105_p4 }
  0x1f   : > { %s111_s13 = sand.u32 (!%p106_p5), 1, %s490_s7  }
  0x20   : > { %109 = sbr.rel (%p106_p5) target bundleno = 425 (0x1a9), region = 24  ;;  %s382_s15 = sshll.u32 (!%p106_p5), %s111_s13, 6 }
  0x21   : > { %s112_s17 = scalar_lea.sflag (!%p106_p5), [#allocation3], %s111_s13  ;;  %s115_s18 = scalar_lea.vmem (!%p106_p5), [#allocation2], %s382_s15 }
  0x25   : > { %481 = dma.done.wait (%p554_p7), %s112_s17, 1024  }
  0x26   : > { %483 = vsyncadd (%p554_p7), %s112_s17, 4294966272  ;;  %v160_v0 = vlaneseq  ;;  %v146_v2 = vld [vmem:[%s115_s18 + $0x10] sm:$0xff]  ;;  %v147_v3 = vld [vmem:[%s115_s18 + $0x18] sm:$0xff]  ;;  %s502_s19 = smov 16   ;;  %vm171_vm1 = vcmask 1047680   ;;  %s503_s16 = smov 114  }
  0x27   : > { %v144_v4 = vld [vmem:[%s115_s18] sm:$0xff]  ;;  %v153_v5 = vrot.slane %v146_v2, 5  ;;  %v157_v6 = vrot.slane %v147_v3, 5  ;;  %v145_v7 = vld [vmem:[%s115_s18 + $0x8] sm:$0xff]  ;;  %v150_v19 = vld [vmem:[%s115_s18 + $0x30] sm:$0xff]  ;;  %s504_s20 = smov 2  }
  0x28   : > { %v161_v1 = vshrl.u32 %v160_v0, 7  ;;  %v152_v8 = vrot.slane %v144_v4, 5  ;;  %v148_v9 = vld [vmem:[%s115_s18 + $0x20] sm:$0xff]  ;;  %v149_v10 = vld [vmem:[%s115_s18 + $0x28] sm:$0xff]  ;;  %v156_v11 = vrot.slane %v145_v7, 5  ;;  %v151_v20 = vld [vmem:[%s115_s18 + $0x38] sm:$0xff] }
  0x29   : > { %v154_v12 = vrot.slane %v148_v9, 5  ;;  %v158_v13 = vrot.slane %v149_v10, 5  ;;  %v155_v22 = vrot.slane %v150_v19, 5  ;;  %v159_v23 = vrot.slane %v151_v20, 5  ;;  %s383_s21 = sshll.u32 %s373_s10, 2 }
  0x2a   : > { %vm162_vm0 = vcmp.lt.s32.totalorder %v161_v1, 3  ;;  %p138_p6 = scmp.lt.s32.totalorder %s383_s21, 7  ;;  %vm252_vm2 = vcmask 130048   ;;  %vm261_vm3 = vcmask 126976   ;;  %vm290_vm4 = vcmask 154752  }
  0x2b   : > { %v168_v14 = vsel %vm162_vm0, %v157_v6, %v153_v5  ;;  %v167_v15 = vsel %vm162_vm0, %v156_v11, %v152_v8  ;;  %v592_v16 = vsel %vm162_vm0, %v158_v13, %v154_v12  ;;  %v164_v17 = vsel %vm162_vm0, %v153_v5, %v157_v6 }
  0x2c   : > { %178 = vrot.lane.b32.xlu1 %v168_v14, %s502_s19  ;;  %172 = vrot.lane.b32.xlu0 %v167_v15, %s502_s19  ;;  %v163_v18 = vsel %vm162_vm0, %v152_v8, %v156_v11  ;;  %v165_v21 = vsel %vm162_vm0, %v154_v12, %v158_v13  ;;  %v166_v24 = vsel %vm162_vm0, %v155_v22, %v159_v23  ;;  %s711_s21 = smov (!%p138_p6, %s383_s21), 7  ;;  %vm299_vm5 = vcmask 151680  }
  0x2d   : > { %184 = vrot.lane.b32.xlu2 %v592_v16, %s502_s19  ;;  %v170_v25 = vsel %vm162_vm0, %v159_v23, %v155_v22  ;;  %s389_s22 = smul.u32 24, %s711_s21 }
  0x2f   : > { %s638_s25 = scalar_lea.vmem %s702_s1, %s389_s22 }
  0x34   : > { %181 = vrot.lane.b32.xlu1 %v164_v17, %s502_s19  ;;  %175 = vrot.lane.b32.xlu0 %v163_v18, %s502_s19 }
  0x35   : > { %187 = vrot.lane.b32.xlu2 %v165_v21, %s502_s19 }
  0x3c   : > { %193 = vrot.lane.b32.xlu1 %v166_v24, %s502_s19  ;;  %190 = vrot.lane.b32.xlu0 %v170_v25, %s502_s19 }
  0x87   : > { %v185_v26 = vpop.permute.xlu2 %184 }
  0x88   : > { %v186_v38 = vsel %vm171_vm1, %v185_v26, %v592_v16 }
  0x8f   : > { %v188_v31 = vpop.permute.xlu2 %187 }
  0x90   : > { %v189_v32 = vsel %vm171_vm1, %v188_v31, %v165_v21 }
  0x9e   : > { %v179_v27 = vpop.permute.xlu1 %178  ;;  %v173_v28 = vpop.permute.xlu0 %172 }
  0x9f   : > { %v180_v29 = vsel %vm171_vm1, %v179_v27, %v168_v14  ;;  %v174_v30 = vsel %vm171_vm1, %v173_v28, %v167_v15 }
  0xa0   : > { %200 = vrot.lane.b32.xlu1 %v180_v29, %s502_s19  ;;  %196 = vrot.lane.b32.xlu2 %v174_v30, %s502_s19 }
  0xa6   : > { %v182_v33 = vpop.permute.xlu1 %181  ;;  %v176_v34 = vpop.permute.xlu0 %175 }
  0xa7   : > { %v183_v35 = vsel %vm171_vm1, %v182_v33, %v164_v17  ;;  %v177_v36 = vsel %vm171_vm1, %v176_v34, %v163_v18 }
  0xa8   : > { %206 = vrot.lane.b32.xlu1 %v189_v32, %s502_s19  ;;  %198 = vrot.lane.b32.xlu0 %v177_v36, %s502_s19 }
  0xa9   : > { %202 = vrot.lane.b32.xlu2 %v183_v35, %s502_s19 }
  0xae   : > { %v191_v37 = vpop.permute.xlu0 %190  ;;  %v194_v40 = vpop.permute.xlu1 %193 }
  0xaf   : > { %v192_v39 = vsel %vm171_vm1, %v191_v37, %v170_v25  ;;  %v195_v41 = vsel %vm171_vm1, %v194_v40, %v166_v24 }
  0xb0   : > { %204 = vrot.lane.b32.xlu0 %v186_v38, %s502_s19 }
  0xb1   : > { %208 = vrot.lane.b32.xlu2 %v192_v39, %s502_s19 }
  0xb8   : > { %210 = vrot.lane.b32.xlu0 %v195_v41, %s502_s19 }
  0xfa   : > { %v197_v42 = vpop.permute.xlu2 %196 }
  0xfb   : > { %v212_v43 = vsel %vm171_vm1, %v197_v42, %v167_v15 }
  0xfc   : > { %228 = vrot.lane.b32.xlu1 %v212_v43, %s503_s16 }
 0x103   : > { %v203_v44 = vpop.permute.xlu2 %202 }
 0x104   : > { %v215_v45 = vsel %vm171_vm1, %v203_v44, %v164_v17 }
 0x105   : > { %234 = vrot.lane.b32.xlu1 %v215_v45, %s503_s16 }
 0x10b   : > { %v209_v46 = vpop.permute.xlu2 %208 }
 0x10c   : > { %v218_v47 = vsel %vm171_vm1, %v209_v46, %v170_v25 }
 0x10d   : > { %240 = vrot.lane.b32.xlu1 %v218_v47, %s503_s16 }
 0x112   : > { %v201_v48 = vpop.permute.xlu1 %200 }
 0x113   : > { %v214_v49 = vsel %vm171_vm1, %v201_v48, %v168_v14 }
 0x114   : > { %232 = vrot.lane.b32.xlu0 %v214_v49, %s503_s16 }
 0x11a   : > { %v207_v50 = vpop.permute.xlu1 %206  ;;  %v199_v51 = vpop.permute.xlu0 %198 }
 0x11b   : > { %v217_v52 = vsel %vm171_vm1, %v207_v50, %v165_v21  ;;  %v213_v53 = vsel %vm171_vm1, %v199_v51, %v163_v18 }
 0x11c   : > { %238 = vrot.lane.b32.xlu0 %v217_v52, %s503_s16  ;;  %268 = vrot.lane.b32.xlu1 %v213_v53, %s504_s20 }
 0x11d   : > { %230 = vrot.lane.b32.xlu2 %v213_v53, %s503_s16 }
 0x122   : > { %v205_v54 = vpop.permute.xlu0 %204 }
 0x123   : > { %v216_v55 = vsel %vm171_vm1, %v205_v54, %v592_v16 }
 0x124   : > { %266 = vrot.lane.b32.xlu0 %v212_v43, %s504_s20  ;;  %274 = vrot.lane.b32.xlu1 %v216_v55, %s504_s20 }
 0x125   : > { %236 = vrot.lane.b32.xlu2 %v216_v55, %s503_s16 }
 0x12a   : > { %v211_v56 = vpop.permute.xlu0 %210 }
 0x12b   : > { %v219_v57 = vsel %vm171_vm1, %v211_v56, %v166_v24 }
 0x12c   : > { %272 = vrot.lane.b32.xlu0 %v215_v45, %s504_s20  ;;  %280 = vrot.lane.b32.xlu1 %v219_v57, %s504_s20 }
 0x12d   : > { %242 = vrot.lane.b32.xlu2 %v219_v57, %s503_s16 }
 0x134   : > { %278 = vrot.lane.b32.xlu0 %v218_v47, %s504_s20 }
 0x135   : > { %270 = vrot.lane.b32.xlu2 %v214_v49, %s504_s20 }
 0x13d   : > { %276 = vrot.lane.b32.xlu2 %v217_v52, %s504_s20 }
 0x16e   : > { %v229_v58 = vpop.permute.xlu1 %228 }
 0x16f   : > { %253 = vst.msk [vmem:[%s638_s25] sm:$0xff] %vm252_vm2, %v229_v58 }
 0x170   : > { %262 = vst.msk [vmem:[%s638_s25 + $0x10] sm:$0x1f] %vm261_vm3, %v229_v58 }
 0x177   : > { %v231_v59 = vpop.permute.xlu2 %230  ;;  %v235_v60 = vpop.permute.xlu1 %234 }
 0x178   : > { %254 = vst.msk [vmem:[%s638_s25 + $0x8] sm:$0xff] %vm252_vm2, %v231_v59 }
 0x179   : > { %256 = vst.msk [vmem:[%s638_s25 + $0x20] sm:$0xff] %vm252_vm2, %v235_v60 }
 0x17f   : > { %v237_v61 = vpop.permute.xlu2 %236  ;;  %v241_v62 = vpop.permute.xlu1 %240 }
 0x180   : > { %257 = vst.msk [vmem:[%s638_s25 + $0x30] sm:$0xff] %vm252_vm2, %v237_v61 }
 0x181   : > { %259 = vst.msk [vmem:[%s638_s25 + $0x48] sm:$0xff] %vm252_vm2, %v241_v62 }
 0x182   : > { %264 = vst.msk [vmem:[%s638_s25 + $0x40] sm:$0x1f] %vm261_vm3, %v237_v61 }
 0x183   : > { %265 = vst.msk [vmem:[%s638_s25 + $0x58] sm:$0x1f] %vm261_vm3, %v241_v62 }
 0x186   : > { %v233_v63 = vpop.permute.xlu0 %232 }
 0x187   : > { %255 = vst.msk [vmem:[%s638_s25 + $0x18] sm:$0xff] %vm252_vm2, %v233_v63  ;;  %v243_v0 = vpop.permute.xlu2 %242 }
 0x188   : > { %263 = vst.msk [vmem:[%s638_s25 + $0x28] sm:$0x1f] %vm261_vm3, %v233_v63 }
 0x189   : > { %260 = vst.msk [vmem:[%s638_s25 + $0x50] sm:$0xff] %vm252_vm2, %v243_v0 }
 0x18e   : > { %v239_v1 = vpop.permute.xlu0 %238  ;;  %v269_v2 = vpop.permute.xlu1 %268 }
 0x18f   : > { %258 = vst.msk [vmem:[%s638_s25 + $0x38] sm:$0xff] %vm252_vm2, %v239_v1  ;;  %v271_v3 = vpop.permute.xlu2 %270 }
 0x190   : > { %292 = vst.msk [vmem:[%s638_s25 + $0x8] sm:$0xff] %vm290_vm4, %v269_v2 }
 0x191   : > { %293 = vst.msk [vmem:[%s638_s25 + $0x18] sm:$0xff] %vm290_vm4, %v271_v3 }
 0x192   : > { %301 = vst.msk [vmem:[%s638_s25 + $0x28] sm:$0x1f] %vm299_vm5, %v271_v3 }
 0x196   : > { %v267_v4 = vpop.permute.xlu0 %266  ;;  %v275_v5 = vpop.permute.xlu1 %274 }
 0x197   : > { %291 = vst.msk [vmem:[%s638_s25] sm:$0xff] %vm290_vm4, %v267_v4  ;;  %v277_v7 = vpop.permute.xlu2 %276 }
 0x198   : > { %300 = vst.msk [vmem:[%s638_s25 + $0x10] sm:$0x1f] %vm299_vm5, %v267_v4 }
 0x199   : > { %295 = vst.msk [vmem:[%s638_s25 + $0x30] sm:$0xff] %vm290_vm4, %v275_v5 }
 0x19a   : > { %302 = vst.msk [vmem:[%s638_s25 + $0x40] sm:$0x1f] %vm299_vm5, %v275_v5 }
 0x19b   : > { %296 = vst.msk [vmem:[%s638_s25 + $0x38] sm:$0xff] %vm290_vm4, %v277_v7 }
 0x19e   : > { %v273_v6 = vpop.permute.xlu0 %272  ;;  %v281_v8 = vpop.permute.xlu1 %280 }
 0x19f   : > { %294 = vst.msk [vmem:[%s638_s25 + $0x20] sm:$0xff] %vm290_vm4, %v273_v6 }
 0x1a0   : > { %298 = vst.msk [vmem:[%s638_s25 + $0x50] sm:$0xff] %vm290_vm4, %v281_v8 }
 0x1a6   : > { %v279_v9 = vpop.permute.xlu0 %278 }
 0x1a7   : > { %297 = vst.msk [vmem:[%s638_s25 + $0x48] sm:$0xff] %vm290_vm4, %v279_v9 }
 0x1a8   : > { %303 = vst.msk [vmem:[%s638_s25 + $0x58] sm:$0x1f] %vm299_vm5, %v279_v9 }
 0x1a9 PF: > { %p11_p7 = scmp.ge.s32.totalorder %s535_s11, 4   ;;  %s706_s6 = smov %s490_s7 }
 0x1aa   : > { %s707_s7 = smov %s494_s8  ;;  %s708_s8 = smov %s545_s14 }
 0x1ab   : > { %s709_s9 = smov %s535_s11  ;;  %13 = sbr.rel (!%p11_p7) target bundleno = 3 (0x3), region = 64 }
 0x1b0   :  { %328 = vsyncpa [#allocation3], 1 }
 0x1b1   :  { %330 = vsyncpa [#allocation3 + $0x1], 1 }

// kernel: tpu_custom_call.1
= control target key start
LH: loop header
LB: loop body
LE: loop exit
PB: predicated region body
PF: predicated region fallthrough
CT: control target
= control target key end

     0   :  { %6 = vsyncpa [#allocation3], 0  ;;  %s911_s0 = inlined_call_operand.hbm [shape: f32[8,16,16], index: 0, kind: input, shape index: {}]   ;;  %s912_s1 = inlined_call_operand.vmem [shape: f32[8,21,19], index: 1, kind: output, shape index: {}]  }
   0x1   :  { %8 = vsyncpa [#allocation3 + $0x1], 0  ;;  %s652_s6 = smov 0   ;;  %s654_s7 = smov 0  }
   0x2   :  { %s656_s8 = smov 0   ;;  %s658_s9 = smov 0  }
   0x3 LB: > { %s510_s10 = sadd.s32 4294967295, %s635_s9   ;;  %s672_s11 = sadd.s32 1, %s635_s9   ;;  %s635_s9 = sphi %s658_s9, %s919_s9   ;;  %s631_s8 = sphi %s656_s8, %s918_s8   ;;  %s627_s7 = sphi %s654_s7, %s917_s7   ;;  %s623_s6 = sphi %s652_s6, %s916_s6  }
   0x4   : > { %s18_s12 = ssub.s32 %s635_s9, %s672_s11  ;;  %s21_s13 = sadd.s32 1, %s631_s8 }
   0x5   : > { %p19_p0 = scmp.eq.s32.totalorder %s18_s12, 0  ;;  %p28_p1 = scmp.ne.s32.totalorder %s631_s8, %s627_s7 }
   0x6   : > { %p29_p2 = scmp.eq.s32.totalorder %s635_s9, 0  ;;  %p34_p3 = scmp.ne.s32.totalorder %s627_s7, %s623_s6 }
   0x7   : > { %s682_s14 = scalar_select %p19_p0, %s631_s8, %s21_s13  }
   0x8   : > { %p684_p4 = por %p29_p2, %p28_p1  ;;  %p35_p5 = scmp.eq.s32.totalorder %s510_s10, 0 }
   0x9   : > { %p533_p6 = scmp.lt.s32.totalorder %s635_s9, 2  ;;  %s84_s17 = sand.u32 1, %s631_s8  }
   0xa   : > { %p691_p7 = por %p35_p5, %p34_p3  ;;  %s514_s18 = sshll.u32 %s84_s17, 6 }
   0xb   : > { %s525_s19 = sshll.u32 %s635_s9, 6  ;;  %s88_s23 = scalar_lea.vmem [#allocation2], %s514_s18 }
   0xc   : > { %s94_s22 = scalar_lea.hbm %s911_s0, %s525_s19  ;;  %s97_s24 = sshll.u32 %s88_s23, 4  ;;  %s98_s24 = int_to_ptr.vmem [resolvable:$true] %s97_s24 }
   0xd   : > { %s95_s25 = sshll.u32 %s94_s22, 4  ;;  %p702_p8 = pnand %p533_p6, %p684_p4  ;;  %s96_s25 = int_to_ptr.hbm [resolvable:$true] %s95_s25 }
   0xe   : > { %p518_p9 = scmp.ge.s32.totalorder %s635_s9, 1  ;;  %s85_s27 = scalar_lea.sflag [#allocation3], %s84_s17 }
   0xf   : > { %s571_s28 = sshra.s32 %s96_s25, 4  ;;  %p575_p11 = pneg %p702_p8  ;;  %s572_s28 = int_to_ptr.hbm [resolvable:$true] %s571_s28 }
  0x10   : > { %s573_s29 = scalar_lea.hbm %s572_s28, 64  ;;  %s578_s3 = scalar_lea.hbm %s911_s0, 128 }
  0x11   : > { %p574_p10 = scmp.ne.s32.totalorder %s572_s28, %s573_s29  ;;  %p579_p0 = scmp.lt.s32.totalorder %s572_s28, %s911_s0 }
  0x12   : > { %p580_p1 = scmp.lt.s32.totalorder %s578_s3, %s573_s29 }
  0x13   : > { %p576_p12 = pnand %p575_p11, %p574_p10 }
  0x14   : > { %p581_p2 = por %p580_p1, %p579_p0 }
  0x15   : > { %p577_p13 = pneg %p576_p12 }
  0x17   : > { %p582_p3 = pnand %p581_p2, %p577_p13 }
  0x19   : > { %585 = shalt.err (!%p582_p3)
}
  0x1a   : > { %s637_s6 = smov 128   ;;  %s638_s12 = smov 8  }
  0x1b   : > { %532 = dma.hbm_to_vmem [thread:$0]  (!%p702_p8), %s96_s25, 1024, %s98_s24, %s85_s27, %s637_s6, %s637_s6, %s638_s12  }
  0x1c   : > { %p105_p4 = scmp.lt.s32.totalorder %s635_s9, 3 }
  0x1e   : > { %p106_p5 = pnand %p518_p9, %p105_p4 }
  0x1f   : > { %s111_s13 = sand.u32 (!%p106_p5), 1, %s627_s7  }
  0x20   : > { %109 = sbr.rel (%p106_p5) target bundleno = 276 (0x114), region = 24  ;;  %s519_s15 = sshll.u32 (!%p106_p5), %s111_s13, 6 }
  0x21   : > { %s112_s17 = scalar_lea.sflag (!%p106_p5), [#allocation3], %s111_s13  ;;  %s721_s18 = scalar_lea.vmem (!%p106_p5), [#allocation2], %s519_s15 }
  0x25   : > { %618 = dma.done.wait (%p691_p7), %s112_s17, 1024  }
  0x26   : > { %620 = vsyncadd (%p691_p7), %s112_s17, 4294966272  ;;  %v144_v0 = vld [vmem:[%s721_s18] sm:$0xff]  ;;  %v146_v1 = vld [vmem:[%s721_s18 + $0x10] sm:$0xff]  ;;  %s639_s19 = smov 2   ;;  %s640_s16 = smov 114   ;;  %vm184_vm0 = vcmask 146448  }
  0x27   : > { %160 = vrot.lane.b32.xlu0 %v144_v0, %s639_s19  ;;  %164 = vrot.lane.b32.xlu1 %v146_v1, %s639_s19  ;;  %v148_v2 = vld [vmem:[%s721_s18 + $0x20] sm:$0xff]  ;;  %v145_v3 = vld [vmem:[%s721_s18 + $0x8] sm:$0xff]  ;;  %s641_s20 = smov 18   ;;  %s520_s21 = sshll.u32 %s510_s10, 2  ;;  %vm233_vm1 = vcmask 15360   ;;  %vm282_vm2 = vcmask 154768  }
  0x28   : > { %168 = vrot.lane.b32.xlu2 %v148_v2, %s639_s19  ;;  %v147_v4 = vld [vmem:[%s721_s18 + $0x18] sm:$0xff]  ;;  %v149_v5 = vld [vmem:[%s721_s18 + $0x28] sm:$0xff]  ;;  %v150_v6 = vld [vmem:[%s721_s18 + $0x30] sm:$0xff]  ;;  %p138_p6 = scmp.lt.s32.totalorder %s520_s21, 7  ;;  %vm386_vm3 = vcmask 140304   ;;  %vm311_vm4 = vcmask 141328  }
  0x29   : > { %v151_v7 = vld [vmem:[%s721_s18 + $0x38] sm:$0xff]  ;;  %v291_v8 = vld [vmem:[%s721_s18 + $0xd] sm:$0x7]  ;;  %v366_v16 = vld [vmem:[%s721_s18] sm:$0x3]  ;;  %vm336_vm5 = vcmask 10240  }
  0x2a   : > { %v292_v9 = vld [vmem:[%s721_s18 + $0x1d] sm:$0x7]  ;;  %v293_v10 = vld [vmem:[%s721_s18 + $0x2d] sm:$0x7]  ;;  %v367_v17 = vld [vmem:[%s721_s18 + $0x10] sm:$0x3] }
  0x2b   : > { %v294_v11 = vld [vmem:[%s721_s18 + $0x3d] sm:$0x7]  ;;  %v316_v12 = vld [vmem:[%s721_s18 + $0xd] sm:$0x7]  ;;  %v368_v18 = vld [vmem:[%s721_s18 + $0x20] sm:$0x3] }
  0x2c   : > { %v317_v13 = vld [vmem:[%s721_s18 + $0x1d] sm:$0x7]  ;;  %v318_v14 = vld [vmem:[%s721_s18 + $0x2d] sm:$0x7]  ;;  %v369_v19 = vld [vmem:[%s721_s18 + $0x30] sm:$0x3] }
  0x2d   : > { %v319_v15 = vld [vmem:[%s721_s18 + $0x3d] sm:$0x7]  ;;  %v391_v21 = vld [vmem:[%s721_s18] sm:$0x3]  ;;  %v392_v22 = vld [vmem:[%s721_s18 + $0x10] sm:$0x3] }
  0x2e   : > { %v393_v23 = vld [vmem:[%s721_s18 + $0x20] sm:$0x3]  ;;  %v394_v25 = vld [vmem:[%s721_s18 + $0x30] sm:$0x3]  ;;  %v341_v26 = vld [vmem:[%s721_s18 + $0xd] sm:$0x7] }
  0x2f   : > { %162 = vrot.lane.b32.xlu0 %v145_v3, %s639_s19  ;;  %166 = vrot.lane.b32.xlu1 %v147_v4, %s639_s19  ;;  %v416_v27 = vld [vmem:[%s721_s18] sm:$0x3]  ;;  %s921_s21 = smov (!%p138_p6, %s520_s21), 7  ;;  %v342_v29 = vld [vmem:[%s721_s18 + $0x1d] sm:$0x7]  ;;  %vm411_vm6 = vcmask 9216  }
  0x30   : > { %170 = vrot.lane.b32.xlu2 %v149_v5, %s639_s19  ;;  %s526_s22 = smul.u32 24, %s921_s21  ;;  %v417_v30 = vld [vmem:[%s721_s18 + $0x10] sm:$0x3]  ;;  %v343_v31 = vld [vmem:[%s721_s18 + $0x2d] sm:$0x7]  ;;  %vm436_vm7 = vcmask 148624  }
  0x31   : > { %v418_v35 = vld [vmem:[%s721_s18 + $0x20] sm:$0x3]  ;;  %v344_v36 = vld [vmem:[%s721_s18 + $0x3d] sm:$0x7]  ;;  %v419_v37 = vld [vmem:[%s721_s18 + $0x30] sm:$0x3] }
  0x32   : > { %s805_s23 = scalar_lea.vmem %s912_s1, %s526_s22  ;;  %vm361_vm8 = vcmask 149648  }
  0x37   : > { %172 = vrot.lane.b32.xlu0 %v150_v6, %s639_s19  ;;  %174 = vrot.lane.b32.xlu1 %v151_v7, %s639_s19 }
  0x38   : > { %209 = vrot.lane.b32.xlu2 %v144_v0, %s640_s16 }
  0x3f   : > { %211 = vrot.lane.b32.xlu0 %v145_v3, %s640_s16  ;;  %213 = vrot.lane.b32.xlu1 %v146_v1, %s640_s16 }
  0x40   : > { %215 = vrot.lane.b32.xlu2 %v147_v4, %s640_s16 }
  0x47   : > { %217 = vrot.lane.b32.xlu0 %v148_v2, %s640_s16  ;;  %219 = vrot.lane.b32.xlu1 %v149_v5, %s640_s16 }
  0x48   : > { %221 = vrot.lane.b32.xlu2 %v150_v6, %s640_s16 }
  0x4f   : > { %223 = vrot.lane.b32.xlu0 %v151_v7, %s640_s16  ;;  %258 = vrot.lane.b32.xlu1 %v144_v0, %s641_s20 }
  0x50   : > { %260 = vrot.lane.b32.xlu2 %v145_v3, %s641_s20 }
  0x57   : > { %262 = vrot.lane.b32.xlu0 %v146_v1, %s641_s20  ;;  %264 = vrot.lane.b32.xlu1 %v147_v4, %s641_s20 }
  0x58   : > { %266 = vrot.lane.b32.xlu2 %v148_v2, %s641_s20 }
  0x5f   : > { %268 = vrot.lane.b32.xlu0 %v149_v5, %s641_s20  ;;  %270 = vrot.lane.b32.xlu1 %v150_v6, %s641_s20 }
  0x60   : > { %272 = vrot.lane.b32.xlu2 %v151_v7, %s641_s20 }
  0x67   : > { %299 = vrot.lane.b32.xlu0 %v291_v8, %s639_s19  ;;  %301 = vrot.lane.b32.xlu1 %v292_v9, %s639_s19 }
  0x68   : > { %303 = vrot.lane.b32.xlu2 %v293_v10, %s639_s19 }
  0x6f   : > { %305 = vrot.lane.b32.xlu0 %v294_v11, %s639_s19  ;;  %324 = vrot.lane.b32.xlu1 %v316_v12, %s640_s16 }
  0x70   : > { %326 = vrot.lane.b32.xlu2 %v317_v13, %s640_s16 }
  0x77   : > { %328 = vrot.lane.b32.xlu0 %v318_v14, %s640_s16  ;;  %330 = vrot.lane.b32.xlu1 %v319_v15, %s640_s16 }
  0x78   : > { %374 = vrot.lane.b32.xlu2 %v366_v16, %s639_s19 }
  0x7f   : > { %376 = vrot.lane.b32.xlu0 %v367_v17, %s639_s19  ;;  %378 = vrot.lane.b32.xlu1 %v368_v18, %s639_s19 }
  0x80   : > { %380 = vrot.lane.b32.xlu2 %v369_v19, %s639_s19 }
  0x82   : > { %v169_v20 = vpop.permute.xlu2 %168 }
  0x83   : > { %189 = vst.msk [vmem:[%s805_s23 + $0x33] sm:$0xff] %vm184_vm0, %v169_v20 }
  0x87   : > { %399 = vrot.lane.b32.xlu0 %v391_v21, %s640_s16  ;;  %401 = vrot.lane.b32.xlu1 %v392_v22, %s640_s16 }
  0x88   : > { %403 = vrot.lane.b32.xlu2 %v393_v23, %s640_s16 }
  0x8a   : > { %v171_v24 = vpop.permute.xlu2 %170 }
  0x8b   : > { %190 = vst.msk [vmem:[%s805_s23 + $0x3b] sm:$0xff] %vm184_vm0, %v171_v24 }
  0x8f   : > { %405 = vrot.lane.b32.xlu0 %v394_v25, %s640_s16  ;;  %349 = vrot.lane.b32.xlu1 %v341_v26, %s641_s20 }
  0x90   : > { %424 = vrot.lane.b32.xlu2 %v416_v27, %s641_s20 }
  0x92   : > { %v210_v28 = vpop.permute.xlu2 %209 }
  0x97   : > { %351 = vrot.lane.b32.xlu0 %v342_v29, %s641_s20  ;;  %426 = vrot.lane.b32.xlu1 %v417_v30, %s641_s20 }
  0x98   : > { %353 = vrot.lane.b32.xlu2 %v343_v31, %s641_s20 }
  0x99   : > { %v161_v32 = vpop.permute.xlu0 %160  ;;  %v165_v33 = vpop.permute.xlu1 %164 }
  0x9a   : > { %185 = vst.msk [vmem:[%s805_s23 + $0x3] sm:$0xff] %vm184_vm0, %v161_v32  ;;  %v216_v34 = vpop.permute.xlu2 %215 }
  0x9b   : > { %187 = vst.msk [vmem:[%s805_s23 + $0x1b] sm:$0xff] %vm184_vm0, %v165_v33 }
  0x9c   : > { %234 = vst.msk [vmem:[%s805_s23 + $0x3] sm:$0xff] %vm233_vm1, %v210_v28 }
  0x9f   : > { %428 = vrot.lane.b32.xlu0 %v418_v35, %s641_s20  ;;  %355 = vrot.lane.b32.xlu1 %v344_v36, %s641_s20 }
  0xa0   : > { %430 = vrot.lane.b32.xlu2 %v419_v37, %s641_s20 }
  0xa1   : > { %v163_v38 = vpop.permute.xlu0 %162  ;;  %v167_v39 = vpop.permute.xlu1 %166 }
  0xa2   : > { %186 = vst.msk [vmem:[%s805_s23 + $0xb] sm:$0xff] %vm184_vm0, %v163_v38  ;;  %v222_v40 = vpop.permute.xlu2 %221 }
  0xa3   : > { %188 = vst.msk [vmem:[%s805_s23 + $0x23] sm:$0xff] %vm184_vm0, %v167_v39 }
  0xa4   : > { %237 = vst.msk [vmem:[%s805_s23 + $0x23] sm:$0xff] %vm233_vm1, %v216_v34 }
  0xa9   : > { %v173_v41 = vpop.permute.xlu0 %172  ;;  %v175_v42 = vpop.permute.xlu1 %174 }
  0xaa   : > { %191 = vst.msk [vmem:[%s805_s23 + $0x4b] sm:$0xff] %vm184_vm0, %v173_v41  ;;  %v261_v43 = vpop.permute.xlu2 %260 }
  0xab   : > { %192 = vst.msk [vmem:[%s805_s23 + $0x53] sm:$0xff] %vm184_vm0, %v175_v42 }
  0xac   : > { %240 = vst.msk [vmem:[%s805_s23 + $0x4b] sm:$0xff] %vm233_vm1, %v222_v40 }
  0xb1   : > { %v212_v44 = vpop.permute.xlu0 %211  ;;  %v214_v45 = vpop.permute.xlu1 %213 }
  0xb2   : > { %235 = vst.msk [vmem:[%s805_s23 + $0xb] sm:$0xff] %vm233_vm1, %v212_v44  ;;  %v267_v46 = vpop.permute.xlu2 %266 }
  0xb3   : > { %236 = vst.msk [vmem:[%s805_s23 + $0x1b] sm:$0xff] %vm233_vm1, %v214_v45 }
  0xb4   : > { %284 = vst.msk [vmem:[%s805_s23 + $0xb] sm:$0xff] %vm282_vm2, %v261_v43 }
  0xb9   : > { %v218_v47 = vpop.permute.xlu0 %217  ;;  %v220_v48 = vpop.permute.xlu1 %219 }
  0xba   : > { %238 = vst.msk [vmem:[%s805_s23 + $0x33] sm:$0xff] %vm233_vm1, %v218_v47  ;;  %v273_v49 = vpop.permute.xlu2 %272 }
  0xbb   : > { %239 = vst.msk [vmem:[%s805_s23 + $0x3b] sm:$0xff] %vm233_vm1, %v220_v48 }
  0xbc   : > { %287 = vst.msk [vmem:[%s805_s23 + $0x33] sm:$0xff] %vm282_vm2, %v267_v46 }
  0xc1   : > { %v224_v50 = vpop.permute.xlu0 %223  ;;  %v259_v51 = vpop.permute.xlu1 %258 }
  0xc2   : > { %241 = vst.msk [vmem:[%s805_s23 + $0x53] sm:$0xff] %vm233_vm1, %v224_v50  ;;  %v304_v52 = vpop.permute.xlu2 %303 }
  0xc3   : > { %283 = vst.msk [vmem:[%s805_s23 + $0x3] sm:$0xff] %vm282_vm2, %v259_v51 }
  0xc4   : > { %290 = vst.msk [vmem:[%s805_s23 + $0x53] sm:$0xff] %vm282_vm2, %v273_v49 }
  0xc5   : > { %314 = vst.msk [vmem:[%s805_s23 + $0x30] sm:$0x7] %vm311_vm4, %v304_v52 }
  0xc9   : > { %v263_v53 = vpop.permute.xlu0 %262  ;;  %v265_v54 = vpop.permute.xlu1 %264 }
  0xca   : > { %285 = vst.msk [vmem:[%s805_s23 + $0x1b] sm:$0xff] %vm282_vm2, %v263_v53  ;;  %v327_v55 = vpop.permute.xlu2 %326 }
  0xcb   : > { %286 = vst.msk [vmem:[%s805_s23 + $0x23] sm:$0xff] %vm282_vm2, %v265_v54 }
  0xd1   : > { %v269_v56 = vpop.permute.xlu0 %268  ;;  %v271_v57 = vpop.permute.xlu1 %270 }
  0xd2   : > { %288 = vst.msk [vmem:[%s805_s23 + $0x3b] sm:$0xff] %vm282_vm2, %v269_v56  ;;  %v375_v58 = vpop.permute.xlu2 %374 }
  0xd3   : > { %289 = vst.msk [vmem:[%s805_s23 + $0x4b] sm:$0xff] %vm282_vm2, %v271_v57 }
  0xd4   : > { %387 = vst.msk [vmem:[%s805_s23 + $0x13] sm:$0x3] %vm386_vm3, %v375_v58 }
  0xd9   : > { %v300_v59 = vpop.permute.xlu0 %299  ;;  %v302_v60 = vpop.permute.xlu1 %301 }
  0xda   : > { %312 = vst.msk [vmem:[%s805_s23] sm:$0x7] %vm311_vm4, %v300_v59  ;;  %v381_v63 = vpop.permute.xlu2 %380 }
  0xdb   : > { %313 = vst.msk [vmem:[%s805_s23 + $0x18] sm:$0x7] %vm311_vm4, %v302_v60 }
  0xdc   : > { %338 = vst.msk [vmem:[%s805_s23 + $0x18] sm:$0x7] %vm336_vm5, %v327_v55 }
  0xdd   : > { %390 = vst.msk [vmem:[%s805_s23 + $0x5b] sm:$0x3] %vm386_vm3, %v381_v63 }
  0xe1   : > { %v306_v61 = vpop.permute.xlu0 %305  ;;  %v325_v62 = vpop.permute.xlu1 %324 }
  0xe2   : > { %315 = vst.msk [vmem:[%s805_s23 + $0x48] sm:$0x7] %vm311_vm4, %v306_v61  ;;  %v404_v4 = vpop.permute.xlu2 %403 }
  0xe3   : > { %337 = vst.msk [vmem:[%s805_s23] sm:$0x7] %vm336_vm5, %v325_v62 }
  0xe9   : > { %v329_v0 = vpop.permute.xlu0 %328  ;;  %v331_v1 = vpop.permute.xlu1 %330 }
  0xea   : > { %339 = vst.msk [vmem:[%s805_s23 + $0x30] sm:$0x7] %vm336_vm5, %v329_v0  ;;  %v425_v7 = vpop.permute.xlu2 %424 }
  0xeb   : > { %340 = vst.msk [vmem:[%s805_s23 + $0x48] sm:$0x7] %vm336_vm5, %v331_v1 }
  0xf1   : > { %v377_v2 = vpop.permute.xlu0 %376  ;;  %v379_v3 = vpop.permute.xlu1 %378 }
  0xf2   : > { %388 = vst.msk [vmem:[%s805_s23 + $0x2b] sm:$0x3] %vm386_vm3, %v377_v2  ;;  %v354_v10 = vpop.permute.xlu2 %353 }
  0xf3   : > { %389 = vst.msk [vmem:[%s805_s23 + $0x43] sm:$0x3] %vm386_vm3, %v379_v3 }
  0xf4   : > { %414 = vst.msk [vmem:[%s805_s23 + $0x43] sm:$0x3] %vm411_vm6, %v404_v4 }
  0xf5   : > { %364 = vst.msk [vmem:[%s805_s23 + $0x30] sm:$0x7] %vm361_vm8, %v354_v10 }
  0xf9   : > { %v400_v5 = vpop.permute.xlu0 %399  ;;  %v402_v6 = vpop.permute.xlu1 %401 }
  0xfa   : > { %412 = vst.msk [vmem:[%s805_s23 + $0x13] sm:$0x3] %vm411_vm6, %v400_v5  ;;  %v431_v13 = vpop.permute.xlu2 %430 }
  0xfb   : > { %413 = vst.msk [vmem:[%s805_s23 + $0x2b] sm:$0x3] %vm411_vm6, %v402_v6 }
  0xfc   : > { %437 = vst.msk [vmem:[%s805_s23 + $0x13] sm:$0x3] %vm436_vm7, %v425_v7 }
 0x101   : > { %v406_v8 = vpop.permute.xlu0 %405  ;;  %v350_v9 = vpop.permute.xlu1 %349 }
 0x102   : > { %415 = vst.msk [vmem:[%s805_s23 + $0x5b] sm:$0x3] %vm411_vm6, %v406_v8 }
 0x103   : > { %362 = vst.msk [vmem:[%s805_s23] sm:$0x7] %vm361_vm8, %v350_v9 }
 0x104   : > { %440 = vst.msk [vmem:[%s805_s23 + $0x5b] sm:$0x3] %vm436_vm7, %v431_v13 }
 0x109   : > { %v352_v11 = vpop.permute.xlu0 %351  ;;  %v427_v12 = vpop.permute.xlu1 %426 }
 0x10a   : > { %363 = vst.msk [vmem:[%s805_s23 + $0x18] sm:$0x7] %vm361_vm8, %v352_v11 }
 0x10b   : > { %438 = vst.msk [vmem:[%s805_s23 + $0x2b] sm:$0x3] %vm436_vm7, %v427_v12 }
 0x111   : > { %v429_v14 = vpop.permute.xlu0 %428  ;;  %v356_v15 = vpop.permute.xlu1 %355 }
 0x112   : > { %439 = vst.msk [vmem:[%s805_s23 + $0x43] sm:$0x3] %vm436_vm7, %v429_v14 }
 0x113   : > { %365 = vst.msk [vmem:[%s805_s23 + $0x48] sm:$0x7] %vm361_vm8, %v356_v15 }
 0x114 PF: > { %p11_p7 = scmp.ge.s32.totalorder %s672_s11, 4   ;;  %s916_s6 = smov %s627_s7 }
 0x115   : > { %s917_s7 = smov %s631_s8  ;;  %s918_s8 = smov %s682_s14 }
 0x116   : > { %s919_s9 = smov %s672_s11  ;;  %13 = sbr.rel (!%p11_p7) target bundleno = 3 (0x3), region = 64 }
 0x11b   :  { %465 = vsyncpa [#allocation3], 1 }
 0x11c   :  { %467 = vsyncpa [#allocation3 + $0x1], 1 }

</bundles_post_ra>
